<compile_context>
chip_gen: v6e
topology: v6e:2x2x1
jax: 0.10.0
libtpu: 0.0.40
codegen_flags: <defaults>
</compile_context>

<pallas_src>
import jax
import jax.numpy as jnp
from jax.experimental import pallas as pl
from jax.experimental.pallas import tpu as pltpu


def _choose_tiles(n, c, hw, elem_bytes, vmem_budget_bytes=8 * 1024 * 1024):
    """Pick (batch_tile, spatial_tile) so a double-buffered x block stays small
    enough for the most conservative scoped-VMEM default (v5e: 16 MiB)."""
    b = min(n, 8)          # sublane-dense output rows; amortize per-step overhead
    thw = hw
    # shrink the spatial tile (multiples of 128 lanes) until 2 pipeline buffers fit
    while thw > 128 and 2 * b * c * thw * elem_bytes > vmem_budget_bytes:
        thw = ((thw // 2 + 127) // 128) * 128
    return b, thw


def _mlp_kernel(avg_ref, max_ref, w1t_ref, w2t_ref, o_ref):
    # avg_ref / max_ref : (N, C) f32      w1t_ref: (C, Cmid)   w2t_ref: (Cmid, C)
    avg = avg_ref[...]
    mx = max_ref[...]
    w1t = w1t_ref[...]
    w2t = w2t_ref[...]
    ha = jnp.maximum(jnp.dot(avg, w1t, preferred_element_type=jnp.float32), 0.0)
    hm = jnp.maximum(jnp.dot(mx, w1t, preferred_element_type=jnp.float32), 0.0)
    y = (jnp.dot(ha, w2t, preferred_element_type=jnp.float32)
         + jnp.dot(hm, w2t, preferred_element_type=jnp.float32))
    o_ref[...] = jax.nn.sigmoid(y).astype(o_ref.dtype)


def channel_attention(x_nchw, w1, w2):
    """x_nchw: (N, C, H, W); w1: (Cmid, C); w2: (C, Cmid). Returns (N, C, 1, 1)."""
    N, C, H, W = x_nchw.shape
    Cmid = w1.shape[0]
    HW = H * W

    # keep x in its native dtype through the DMA (no extra HBM pass from a wrapper cast)
    x_flat = x_nchw.reshape(N, C, HW)
    w1t = jnp.transpose(w1).astype(jnp.float32)      # (C, Cmid)
    w2t = jnp.transpose(w2).astype(jnp.float32)      # (Cmid, C)

    elem = jnp.dtype(x_flat.dtype).itemsize
    B, THW = _choose_tiles(N, C, HW, elem)
    nb = pl.cdiv(N, B)
    nk = pl.cdiv(HW, THW)
    needs_hw_mask = (HW % THW) != 0

    # ---- Kernel 1: pooled avg / max over the spatial axis --------------------
    def pool_kernel(x_ref, avg_ref, max_ref, sum_acc, max_acc):
        k = pl.program_id(1)

        @pl.when(k == 0)
        def _():
            sum_acc[...] = jnp.zeros_like(sum_acc)
            max_acc[...] = jnp.full_like(max_acc, -jnp.inf)

        x = x_ref[...].astype(jnp.float32)            # (B, C, THW), accumulate in f32
        if needs_hw_mask:                             # static branch: only when HW % THW != 0
            lane = jax.lax.broadcasted_iota(jnp.int32, x.shape, 2)
            valid = (k * THW + lane) < HW
            xs = jnp.where(valid, x, 0.0)
            xm = jnp.where(valid, x, -jnp.inf)
        else:
            xs, xm = x, x

        sum_acc[...] += jnp.sum(xs, axis=-1)          # (B, C)
        max_acc[...] = jnp.maximum(max_acc[...], jnp.max(xm, axis=-1))

        @pl.when(k == pl.num_programs(1) - 1)
        def _():
            avg_ref[...] = (sum_acc[...] * (1.0 / HW)).astype(avg_ref.dtype)
            max_ref[...] = max_acc[...].astype(max_ref.dtype)

    pooled_avg, pooled_max = pl.pallas_call(
        pool_kernel,
        out_shape=(jax.ShapeDtypeStruct((N, C), jnp.float32),
                   jax.ShapeDtypeStruct((N, C), jnp.float32)),
        grid_spec=pltpu.PrefetchScalarGridSpec(
            num_scalar_prefetch=0,
            grid=(nb, nk),
            in_specs=[pl.BlockSpec((B, C, THW), lambda b, k: (b, 0, k))],
            out_specs=[pl.BlockSpec((B, C), lambda b, k: (b, 0)),
                       pl.BlockSpec((B, C), lambda b, k: (b, 0))],
            scratch_shapes=[pltpu.VMEM((B, C), jnp.float32),
                            pltpu.VMEM((B, C), jnp.float32)],
        ),
        compiler_params=pltpu.CompilerParams(
            dimension_semantics=("parallel", "arbitrary")),
        cost_estimate=pl.CostEstimate(
            flops=2 * N * C * HW,                     # one add + one max per element
            transcendentals=0,
            bytes_accessed=N * C * HW * elem + 2 * N * C * 4),
    )(x_flat)

    # ---- Kernel 2: shared MLP + sigmoid, once for the whole batch ------------
    out = pl.pallas_call(
        _mlp_kernel,
        out_shape=jax.ShapeDtypeStruct((N, C), x_nchw.dtype),
        grid_spec=pltpu.PrefetchScalarGridSpec(
            num_scalar_prefetch=0,
            grid=(1,),
            in_specs=[pl.BlockSpec((N, C), lambda i: (0, 0)),
                      pl.BlockSpec((N, C), lambda i: (0, 0)),
                      pl.BlockSpec((C, Cmid), lambda i: (0, 0)),
                      pl.BlockSpec((Cmid, C), lambda i: (0, 0))],
            out_specs=pl.BlockSpec((N, C), lambda i: (0, 0)),
        ),
    )(pooled_avg, pooled_max, w1t, w2t)

    return out.reshape(N, C, 1, 1)


def channel_attention_ref(x_nchw, w1, w2):
    """Pure-JAX reference matching the PyTorch forward."""
    avg = jnp.mean(x_nchw, axis=(2, 3))              # (N, C)
    mx = jnp.max(x_nchw, axis=(2, 3))                # (N, C)

    def mlp(p):
        h = jnp.maximum(p @ w1.T, 0.0)               # (N, Cmid)
        return h @ w2.T                              # (N, C)

    out = jax.nn.sigmoid(mlp(avg) + mlp(mx))
    return out.reshape(*out.shape, 1, 1)


if __name__ == "__main__":
    # in_channels=64, reduction=16 -> hidden=4 ; batch=2, spatial=16x16
    N, C, H, W = 2, 64, 16, 16
    reduction = 16
    Cmid = C // reduction

    key = jax.random.PRNGKey(0)
    kx, k1, k2 = jax.random.split(key, 3)
    x = jax.random.normal(kx, (N, C, H, W), dtype=jnp.float32)
    # deterministic "kaiming-ish" init for the 1x1 conv weights (no bias)
    w1 = jax.random.normal(k1, (Cmid, C), dtype=jnp.float32) * (2.0 / C) ** 0.5
    w2 = jax.random.normal(k2, (C, Cmid), dtype=jnp.float32) * (2.0 / Cmid) ** 0.5

    out = channel_attention(x, w1, w2)
    out = jax.block_until_ready(out)

    ref = channel_attention_ref(x, w1, w2)
    assert out.shape == (N, C, 1, 1)
    assert jnp.allclose(out, ref, atol=1e-5, rtol=1e-5)

    print("KERNEL_OK")
</pallas_src>

<mosaic_0001>
module attributes {stable_mosaic.version = 11 : i64} {
  func.func @pool_kernel(%arg0: i32, %arg1: i32, %arg2: memref<2x64x256xf32, #tpu.memory_space<vmem>>, %arg3: memref<2x64xf32, #tpu.memory_space<vmem>>, %arg4: memref<2x64xf32, #tpu.memory_space<vmem>>, %arg5: memref<2x64xf32, #tpu.memory_space<vmem>>, %arg6: memref<2x64xf32, #tpu.memory_space<vmem>>) attributes {dimension_semantics = [#tpu.dimension_semantics<parallel>, #tpu.dimension_semantics<arbitrary>], iteration_bounds = array<i64: 1, 1>, scalar_prefetch = 0 : i64, scratch_operands = 2 : i64, tpu.core_type = #tpu.core_type<tc>, window_params = [{transform_indices = @transform_0, window_bounds = array<i64: 2, 64, 256>}, {transform_indices = @transform_1, window_bounds = array<i64: 2, 64>}, {transform_indices = @transform_2, window_bounds = array<i64: 2, 64>}]} {
    %c0_i32 = arith.constant 0 : i32
    %0 = arith.cmpi eq, %arg1, %c0_i32 : i32
    %1 = arith.extui %0 : i1 to i32
    %c0_i32_0 = arith.constant 0 : i32
    %2 = arith.cmpi ne, %1, %c0_i32_0 : i32
    scf.if %2 {
      %cst_14 = arith.constant 0.000000e+00 : f32
      %15 = vector.broadcast %cst_14 : f32 to vector<2x64xf32>
      %c0_15 = arith.constant 0 : index
      %c0_16 = arith.constant 0 : index
      %16 = vector.load %arg5[%c0_15, %c0_16] : memref<2x64xf32, #tpu.memory_space<vmem>>, vector<2x64xf32>
      tpu.vector_store %arg5[%c0_15, %c0_16], %15 {strides = array<i32>} : memref<2x64xf32, #tpu.memory_space<vmem>>, vector<2x64xf32>,
      %cst_17 = arith.constant 0xFF800000 : f32
      %17 = vector.broadcast %cst_17 : f32 to vector<2x64xf32>
      %c0_18 = arith.constant 0 : index
      %c0_19 = arith.constant 0 : index
      %18 = vector.load %arg6[%c0_18, %c0_19] : memref<2x64xf32, #tpu.memory_space<vmem>>, vector<2x64xf32>
      tpu.vector_store %arg6[%c0_18, %c0_19], %17 {strides = array<i32>} : memref<2x64xf32, #tpu.memory_space<vmem>>, vector<2x64xf32>,
    } else {
    }
    %c0 = arith.constant 0 : index
    %c0_1 = arith.constant 0 : index
    %c0_2 = arith.constant 0 : index
    %3 = vector.load %arg2[%c0, %c0_1, %c0_2] : memref<2x64x256xf32, #tpu.memory_space<vmem>>, vector<2x64x256xf32>
    %c0_3 = arith.constant 0 : index
    %c0_4 = arith.constant 0 : index
    %4 = vector.load %arg5[%c0_3, %c0_4] : memref<2x64xf32, #tpu.memory_space<vmem>>, vector<2x64xf32>
    %cst = arith.constant dense<0.000000e+00> : vector<2x64xf32>
    %5 = vector.multi_reduction <add>, %3, %cst [2] : vector<2x64x256xf32> to vector<2x64xf32>
    %6 = arith.addf %4, %5 : vector<2x64xf32>
    %c0_5 = arith.constant 0 : index
    %c0_6 = arith.constant 0 : index
    %7 = vector.load %arg5[%c0_5, %c0_6] : memref<2x64xf32, #tpu.memory_space<vmem>>, vector<2x64xf32>
    tpu.vector_store %arg5[%c0_5, %c0_6], %6 {strides = array<i32>} : memref<2x64xf32, #tpu.memory_space<vmem>>, vector<2x64xf32>,
    %c0_7 = arith.constant 0 : index
    %c0_8 = arith.constant 0 : index
    %8 = vector.load %arg6[%c0_7, %c0_8] : memref<2x64xf32, #tpu.memory_space<vmem>>, vector<2x64xf32>
    %cst_9 = arith.constant dense<0xFF800000> : vector<2x64xf32>
    %9 = vector.multi_reduction <maximumf>, %3, %cst_9 [2] : vector<2x64x256xf32> to vector<2x64xf32>
    %10 = arith.maximumf %8, %9 : vector<2x64xf32>
    %c0_10 = arith.constant 0 : index
    %c0_11 = arith.constant 0 : index
    %11 = vector.load %arg6[%c0_10, %c0_11] : memref<2x64xf32, #tpu.memory_space<vmem>>, vector<2x64xf32>
    tpu.vector_store %arg6[%c0_10, %c0_11], %10 {strides = array<i32>} : memref<2x64xf32, #tpu.memory_space<vmem>>, vector<2x64xf32>,
    %c0_i32_12 = arith.constant 0 : i32
    %12 = arith.cmpi eq, %arg1, %c0_i32_12 : i32
    %13 = arith.extui %12 : i1 to i32
    %c0_i32_13 = arith.constant 0 : i32
    %14 = arith.cmpi ne, %13, %c0_i32_13 : i32
    scf.if %14 {
      %c0_14 = arith.constant 0 : index
      %c0_15 = arith.constant 0 : index
      %15 = vector.load %arg5[%c0_14, %c0_15] : memref<2x64xf32, #tpu.memory_space<vmem>>, vector<2x64xf32>
      %cst_16 = arith.constant 3.906250e-03 : f32
      %16 = vector.broadcast %cst_16 : f32 to vector<2x64xf32>
      %17 = arith.mulf %15, %16 : vector<2x64xf32>
      %c0_17 = arith.constant 0 : index
      %c0_18 = arith.constant 0 : index
      %18 = vector.load %arg3[%c0_17, %c0_18] : memref<2x64xf32, #tpu.memory_space<vmem>>, vector<2x64xf32>
      tpu.vector_store %arg3[%c0_17, %c0_18], %17 {strides = array<i32>} : memref<2x64xf32, #tpu.memory_space<vmem>>, vector<2x64xf32>,
      %c0_19 = arith.constant 0 : index
      %c0_20 = arith.constant 0 : index
      %19 = vector.load %arg6[%c0_19, %c0_20] : memref<2x64xf32, #tpu.memory_space<vmem>>, vector<2x64xf32>
      %c0_21 = arith.constant 0 : index
      %c0_22 = arith.constant 0 : index
      %20 = vector.load %arg4[%c0_21, %c0_22] : memref<2x64xf32, #tpu.memory_space<vmem>>, vector<2x64xf32>
      tpu.vector_store %arg4[%c0_21, %c0_22], %19 {strides = array<i32>} : memref<2x64xf32, #tpu.memory_space<vmem>>, vector<2x64xf32>,
    } else {
    }
    return
  }
  func.func @transform_0(%arg0: i32, %arg1: i32) -> (i32, i32, i32) {
    %c0_i32 = arith.constant 0 : i32
    %c0_i32_0 = arith.constant 0 : i32
    return %arg0, %c0_i32, %arg1 : i32, i32, i32
  }
  func.func @transform_1(%arg0: i32, %arg1: i32) -> (i32, i32) {
    %c0_i32 = arith.constant 0 : i32
    %c0_i32_0 = arith.constant 0 : i32
    return %arg0, %c0_i32 : i32, i32
  }
  func.func @transform_2(%arg0: i32, %arg1: i32) -> (i32, i32) {
    %c0_i32 = arith.constant 0 : i32
    %c0_i32_0 = arith.constant 0 : i32
    return %arg0, %c0_i32 : i32, i32
  }
}

</mosaic_0001>

<bundles_post_ra>
// kernel: tpu_custom_call.1
= control target key start
LH: loop header
LB: loop body
LE: loop exit
PB: predicated region body
PF: predicated region fallthrough
CT: control target
= control target key end

     0   :  { %8 = vsyncpa [#allocation5], 0  ;;  %s626_s0 = inlined_call_operand.hbm [shape: f32[2,64,256], index: 0, kind: input, shape index: {}]   ;;  %s627_s1 = inlined_call_operand.hbm [shape: f32[2,64], index: 1, kind: output, shape index: {0}]   ;;  %s628_s2 = inlined_call_operand.hbm [shape: f32[2,64], index: 2, kind: output, shape index: {1}]  }
   0x1   :  { %9 = vsyncpa [#allocation6], 0 }
   0x2   :  { %10 = vsyncpa [#allocation9], 0  ;;  %s487_s9 = smov [#allocation4]  }
   0x3   :  { %s16_s10 = sshll.u32 %s487_s9, 4  ;;  %s17_s10 = int_to_ptr.vmem [resolvable:$true] %s16_s10 }
   0x4   :  { %s429_s11 = scalar_lea.vmem %s17_s10, 4096  ;;  %p434_p1 = scmp.lt.s32.totalorder %s17_s10, %s17_s10 }
   0x5   :  { %p430_p0 = scmp.ne.s32.totalorder %s17_s10, %s429_s11  ;;  %p435_p2 = scmp.lt.s32.totalorder %s429_s11, %s429_s11 }
   0x7   :  { %p436_p3 = por %p435_p2, %p434_p1 }
   0x9   :  { %p437_p4 = pnand %p436_p3, %p430_p0 }
   0xb   :  { %440 = shalt.err (!%p437_p4)
}
   0xc   :  { %s488_s12 = smov 256   ;;  %s489_s13 = smov 16  }
   0xd   :  { %22 = dma.hbm_to_vmem [thread:$0]  %s626_s0, 4096, %s17_s10, [#allocation5], %s488_s12, %s488_s12, %s489_s13  }
   0xe   :  { %481 = dma.done.wait [#allocation5], 4096  }
   0xf   :  { %482 = vsyncadd [#allocation5], 4294963200  ;;  %v49_v0 = vld [vmem:[#allocation4 + $0x80] sm:$0xff]  ;;  %v50_v1 = vld [vmem:[#allocation4 + $0x88] sm:$0xff]  ;;  %vm30_vm0 = vcmask 517120   ;;  %v490_v62 = vmov 0.0  }
  0x10   :  { %v33_v2 = vld [vmem:[#allocation4] sm:$0xff]  ;;  %v90_v3 = vadd.f32 %v50_v1, %v49_v0  ;;  %v34_v4 = vld [vmem:[#allocation4 + $0x8] sm:$0xff]  ;;  %v51_v5 = vld [vmem:[#allocation4 + $0x90] sm:$0xff]  ;;  %v255_v27 = vmax.f32 %v49_v0, %v50_v1  ;;  %31 = vst.msk [vmem:[#allocation2] sm:$0x3] %vm30_vm0, %v490_v62  ;;  %v491_v1 = vmov -inf  }
  0x11   :  { %v52_v6 = vld [vmem:[#allocation4 + $0x98] sm:$0xff]  ;;  %v66_v7 = vadd.f32 %v34_v4, %v33_v2  ;;  %v35_v8 = vld [vmem:[#allocation4 + $0x10] sm:$0xff]  ;;  %v53_v12 = vld [vmem:[#allocation4 + $0xa0] sm:$0xff]  ;;  %v231_v25 = vmax.f32 %v33_v2, %v34_v4  ;;  %32 = vst.msk [vmem:[#allocation3] sm:$0x3] %vm30_vm0, %v491_v1  ;;  %vm141_vm1 = vcmask 130112  }
  0x12   :  { %v36_v9 = vld [vmem:[#allocation4 + $0x18] sm:$0xff]  ;;  %91 = vadd.xlane.f32.xlu1 %v90_v3  ;;  %v93_v10 = vadd.f32 %v52_v6, %v51_v5  ;;  %v54_v13 = vld [vmem:[#allocation4 + $0xa8] sm:$0xff]  ;;  %v37_v14 = vld [vmem:[#allocation4 + $0x20] sm:$0xff]  ;;  %v258_v26 = vmax.f32 %v51_v5, %v52_v6  ;;  %vm148_vm2 = vcmask 195712   ;;  %vm155_vm3 = vcmask 261312   ;;  %s492_s0 = smov [#allocation7]  }
  0x13   :  { %67 = vadd.xlane.f32.xlu0 %v66_v7  ;;  %v69_v11 = vadd.f32 %v36_v9, %v35_v8  ;;  %v38_v15 = vld [vmem:[#allocation4 + $0x28] sm:$0xff]  ;;  %v96_v16 = vadd.f32 %v54_v13, %v53_v12  ;;  %v55_v18 = vld [vmem:[#allocation4 + $0xb0] sm:$0xff]  ;;  %v56_v19 = vld [vmem:[#allocation4 + $0xb8] sm:$0xff]  ;;  %v234_v24 = vmax.f32 %v35_v8, %v36_v9  ;;  %v261_v34 = vmax.f32 %v53_v12, %v54_v13  ;;  %s391_s16 = sshll.u32 %s492_s0, 4  ;;  %s392_s16 = int_to_ptr.vmem [resolvable:$true] %s391_s16 }
  0x14   :  { %v72_v17 = vadd.f32 %v38_v15, %v37_v14  ;;  %v39_v20 = vld [vmem:[#allocation4 + $0x30] sm:$0xff]  ;;  %v40_v21 = vld [vmem:[#allocation4 + $0x38] sm:$0xff]  ;;  %v99_v22 = vadd.f32 %v56_v19, %v55_v18  ;;  %v57_v28 = vld [vmem:[#allocation4 + $0xc0] sm:$0xff]  ;;  %v237_v35 = vmax.f32 %v37_v14, %v38_v15  ;;  %v264_v42 = vmax.f32 %v55_v18, %v56_v19  ;;  %s441_s17 = scalar_lea.vmem %s392_s16, 32  ;;  %p446_p6 = scmp.lt.s32.totalorder %s392_s16, %s392_s16 }
  0x15   :  { %v75_v23 = vadd.f32 %v40_v21, %v39_v20  ;;  %v58_v29 = vld [vmem:[#allocation4 + $0xc8] sm:$0xff]  ;;  %v41_v30 = vld [vmem:[#allocation4 + $0x40] sm:$0xff]  ;;  %v59_v36 = vld [vmem:[#allocation4 + $0xd0] sm:$0xff]  ;;  %v240_v43 = vmax.f32 %v39_v20, %v40_v21  ;;  %vm162_vm4 = vcmask 326912   ;;  %vm169_vm5 = vcmask 392512   ;;  %p442_p5 = scmp.ne.s32.totalorder %s392_s16, %s441_s17  ;;  %p447_p7 = scmp.lt.s32.totalorder %s441_s17, %s441_s17 }
  0x16   :  { %94 = vadd.xlane.f32.xlu1 %v93_v10  ;;  %v42_v31 = vld [vmem:[#allocation4 + $0x48] sm:$0xff]  ;;  %v102_v32 = vadd.f32 %v58_v29, %v57_v28  ;;  %v60_v37 = vld [vmem:[#allocation4 + $0xd8] sm:$0xff]  ;;  %v43_v38 = vld [vmem:[#allocation4 + $0x50] sm:$0xff]  ;;  %v267_v50 = vmax.f32 %v57_v28, %v58_v29  ;;  %vm176_vm6 = vcmask 458112   ;;  %vm183_vm7 = vcmask 523712  }
  0x17   :  { %70 = vadd.xlane.f32.xlu0 %v69_v11  ;;  %v78_v33 = vadd.f32 %v42_v31, %v41_v30  ;;  %v44_v39 = vld [vmem:[#allocation4 + $0x58] sm:$0xff]  ;;  %v105_v40 = vadd.f32 %v60_v37, %v59_v36  ;;  %v61_v44 = vld [vmem:[#allocation4 + $0xe0] sm:$0xff]  ;;  %v62_v45 = vld [vmem:[#allocation4 + $0xe8] sm:$0xff]  ;;  %v243_v51 = vmax.f32 %v41_v30, %v42_v31  ;;  %v270_v58 = vmax.f32 %v59_v36, %v60_v37  ;;  %p448_p8 = por %p447_p7, %p446_p6 }
  0x18   :  { %v81_v41 = vadd.f32 %v44_v39, %v43_v38  ;;  %v45_v46 = vld [vmem:[#allocation4 + $0x60] sm:$0xff]  ;;  %v46_v47 = vld [vmem:[#allocation4 + $0x68] sm:$0xff]  ;;  %v108_v48 = vadd.f32 %v62_v45, %v61_v44  ;;  %v63_v52 = vld [vmem:[#allocation4 + $0xf0] sm:$0xff]  ;;  %v246_v59 = vmax.f32 %v43_v38, %v44_v39  ;;  %v273_v60 = vmax.f32 %v61_v44, %v62_v45 }
  0x19   :  { %v84_v49 = vadd.f32 %v46_v47, %v45_v46  ;;  %v64_v53 = vld [vmem:[#allocation4 + $0xf8] sm:$0xff]  ;;  %v47_v54 = vld [vmem:[#allocation4 + $0x70] sm:$0xff]  ;;  %v249_v61 = vmax.f32 %v45_v46, %v46_v47  ;;  %vm224_vm8 = vcmask 1041409   ;;  %p449_p9 = pnand %p448_p8, %p442_p5 }
  0x1a   :  { %97 = vadd.xlane.f32.xlu1 %v96_v16  ;;  %v48_v55 = vld [vmem:[#allocation4 + $0x78] sm:$0xff]  ;;  %v111_v56 = vadd.f32 %v64_v53, %v63_v52  ;;  %v276_v63 = vmax.f32 %v63_v52, %v64_v53  ;;  %v130_v16 = vlaneseq }
  0x1b   :  { %73 = vadd.xlane.f32.xlu0 %v72_v17  ;;  %v87_v57 = vadd.f32 %v48_v55, %v47_v54  ;;  %v252_v0 = vmax.f32 %v47_v54, %v48_v55 }
  0x1c   :  { %v131_v19 = vand.u32 127, %v130_v16 }
  0x1e   :  { %100 = vadd.xlane.f32.xlu1 %v99_v22  ;;  %v136_v21 = vadd.s32 4294967288, %v131_v19  ;;  %v164_v29 = vadd.s32 4294967256, %v131_v19 }
  0x1f   :  { %76 = vadd.xlane.f32.xlu0 %v75_v23  ;;  %v143_v23 = vadd.s32 4294967280, %v131_v19 }
  0x22   :  { %235 = vmax.xlane.f32.xlu1 %v234_v24  ;;  %v133_v24 = vshrl.u32 %v130_v16, 7 }
  0x23   :  { %232 = vmax.xlane.f32.xlu0 %v231_v25  ;;  %v150_v25 = vadd.s32 4294967272, %v131_v19 }
  0x24   :  { %v528_v28 = vsub.s32 %v136_v21, %v133_v24  ;;  %v532_v31 = vsub.s32 %v143_v23, %v133_v24  ;;  %v541_v38 = vsub.s32 %v164_v29, %v133_v24 }
  0x26   :  { %259 = vmax.xlane.f32.xlu1 %v258_v26  ;;  %v157_v26 = vadd.s32 4294967264, %v131_v19 }
  0x27   :  { %256 = vmax.xlane.f32.xlu0 %v255_v27 }
  0x2a   :  { %103 = vadd.xlane.f32.xlu1 %v102_v32  ;;  %v171_v32 = vadd.s32 4294967248, %v131_v19 }
  0x2b   :  { %79 = vadd.xlane.f32.xlu0 %v78_v33  ;;  %v534_v33 = vsub.s32 %v131_v19, %v133_v24 }
  0x2e   :  { %262 = vmax.xlane.f32.xlu1 %v261_v34  ;;  %v536_v34 = vsub.s32 %v150_v25, %v133_v24 }
  0x2f   :  { %238 = vmax.xlane.f32.xlu0 %v237_v35  ;;  %v538_v35 = vsub.s32 %v157_v26, %v133_v24 }
  0x32   :  { %106 = vadd.xlane.f32.xlu1 %v105_v40  ;;  %v178_v40 = vadd.s32 4294967240, %v131_v19 }
  0x33   :  { %82 = vadd.xlane.f32.xlu0 %v81_v41 }
  0x34   :  { %v556_v55 = vsub.s32 %v178_v40, %v133_v24 }
  0x36   :  { %265 = vmax.xlane.f32.xlu1 %v264_v42 }
  0x37   :  { %241 = vmax.xlane.f32.xlu0 %v240_v43  ;;  %v545_v43 = vsub.s32 %v171_v32, %v133_v24 }
  0x3a   :  { %109 = vadd.xlane.f32.xlu1 %v108_v48 }
  0x3b   :  { %85 = vadd.xlane.f32.xlu0 %v84_v49 }
  0x3e   :  { %268 = vmax.xlane.f32.xlu1 %v267_v50 }
  0x3f   :  { %244 = vmax.xlane.f32.xlu0 %v243_v51 }
  0x42   :  { %112 = vadd.xlane.f32.xlu1 %v111_v56 }
  0x43   :  { %88 = vadd.xlane.f32.xlu0 %v87_v57 }
  0x46   :  { %271 = vmax.xlane.f32.xlu1 %v270_v58 }
  0x47   :  { %247 = vmax.xlane.f32.xlu0 %v246_v59 }
  0x4a   :  { %274 = vmax.xlane.f32.xlu1 %v273_v60 }
  0x4b   :  { %250 = vmax.xlane.f32.xlu0 %v249_v61 }
  0x4e   :  { %277 = vmax.xlane.f32.xlu1 %v276_v63 }
  0x4f   :  { %253 = vmax.xlane.f32.xlu0 %v252_v0 }
  0x9b   :  { %v92_v2 = vpop.xlane.xlu1 %91 }
  0x9c   :  { %v68_v3 = vpop.xlane.xlu0 %67  ;;  %v188_v44 = vrot.slane %v92_v2, %v534_v33 }
  0x9d   :  { %v135_v47 = vrot.slane %v68_v3, %v534_v33 }
  0x9f   :  { %v95_v4 = vpop.xlane.xlu1 %94 }
  0xa0   :  { %v71_v5 = vpop.xlane.xlu0 %70  ;;  %v192_v37 = vrot.slane %v95_v4, %v528_v28 }
  0xa1   :  { %v140_v41 = vrot.slane %v71_v5, %v528_v28 }
  0xa2   :  { %v193_v51 = vsel %vm141_vm1, %v192_v37, %v188_v44 }
  0xa3   :  { %v98_v6 = vpop.xlane.xlu1 %97  ;;  %v142_v56 = vsel %vm141_vm1, %v140_v41, %v135_v47 }
  0xa4   :  { %v74_v7 = vpop.xlane.xlu0 %73  ;;  %v197_v42 = vrot.slane %v98_v6, %v532_v31 }
  0xa5   :  { %v147_v45 = vrot.slane %v74_v7, %v532_v31 }
  0xa6   :  { %v198_v57 = vsel %vm148_vm2, %v197_v42, %v193_v51 }
  0xa7   :  { %v101_v8 = vpop.xlane.xlu1 %100  ;;  %v149_v60 = vsel %vm148_vm2, %v147_v45, %v142_v56 }
  0xa8   :  { %v77_v9 = vpop.xlane.xlu0 %76  ;;  %v202_v46 = vrot.slane %v101_v8, %v536_v34 }
  0xa9   :  { %v154_v48 = vrot.slane %v77_v9, %v536_v34 }
  0xaa   :  { %v203_v61 = vsel %vm155_vm3, %v202_v46, %v198_v57 }
  0xab   :  { %v514_v10 = vpop.xlane.xlu1 %235  ;;  %v156_v63 = vsel %vm155_vm3, %v154_v48, %v149_v60 }
  0xac   :  { %v516_v11 = vpop.xlane.xlu0 %232  ;;  %v302_v24 = vrot.slane %v514_v10, %v528_v28 }
  0xad   :  { %v298_v25 = vrot.slane %v516_v11, %v534_v33 }
  0xaf   :  { %v518_v12 = vpop.xlane.xlu1 %259 }
  0xb0   :  { %v520_v13 = vpop.xlane.xlu0 %256 }
  0xb1   :  { %v337_v21 = vrot.slane %v520_v13, %v534_v33 }
  0xb3   :  { %v104_v14 = vpop.xlane.xlu1 %103 }
  0xb4   :  { %v80_v15 = vpop.xlane.xlu0 %79  ;;  %v207_v49 = vrot.slane %v104_v14, %v538_v35 }
  0xb5   :  { %v161_v52 = vrot.slane %v80_v15, %v538_v35  ;;  %v65_v15 = vld [vmem:[#allocation2] sm:$0x3] }
  0xb6   :  { %v208_v0 = vsel %vm162_vm4, %v207_v49, %v203_v61 }
  0xb7   :  { %v522_v17 = vpop.xlane.xlu1 %262  ;;  %v163_v2 = vsel %vm162_vm4, %v161_v52, %v156_v63 }
  0xb8   :  { %v524_v18 = vpop.xlane.xlu0 %238  ;;  %v346_v26 = vrot.slane %v522_v17, %v532_v31 }
  0xb9   :  { %v307_v32 = vrot.slane %v524_v18, %v532_v31  ;;  %v303_v18 = vsel %vm141_vm1, %v302_v24, %v298_v25 }
  0xbb   :  { %v107_v20 = vpop.xlane.xlu1 %106 }
  0xbc   :  { %v83_v22 = vpop.xlane.xlu0 %82  ;;  %v212_v53 = vrot.slane %v107_v20, %v541_v38  ;;  %v341_v20 = vrot.slane %v518_v12, %v528_v28 }
  0xbd   :  { %v168_v58 = vrot.slane %v83_v22, %v541_v38 }
  0xbe   :  { %v213_v3 = vsel %vm169_vm5, %v212_v53, %v208_v0  ;;  %v342_v11 = vsel %vm141_vm1, %v341_v20, %v337_v21 }
  0xbf   :  { %v526_v27 = vpop.xlane.xlu1 %265  ;;  %v170_v6 = vsel %vm169_vm5, %v168_v58, %v163_v2  ;;  %v347_v31 = vsel %vm148_vm2, %v346_v26, %v342_v11 }
  0xc0   :  { %v530_v30 = vpop.xlane.xlu0 %241  ;;  %v351_v12 = vrot.slane %v526_v27, %v536_v34 }
  0xc1   :  { %v312_v13 = vrot.slane %v530_v30, %v536_v34  ;;  %v308_v34 = vsel %vm148_vm2, %v307_v32, %v303_v18 }
  0xc2   :  { %v352_v37 = vsel %vm155_vm3, %v351_v12, %v347_v31 }
  0xc3   :  { %v110_v36 = vpop.xlane.xlu1 %109  ;;  %v313_v40 = vsel %vm155_vm3, %v312_v13, %v308_v34 }
  0xc4   :  { %v86_v39 = vpop.xlane.xlu0 %85  ;;  %v217_v59 = vrot.slane %v110_v36, %v545_v43 }
  0xc5   :  { %v175_v62 = vrot.slane %v86_v39, %v545_v43 }
  0xc6   :  { %v218_v7 = vsel %vm176_vm6, %v217_v59, %v213_v3 }
  0xc7   :  { %v269_v50 = vpop.xlane.xlu1 %268  ;;  %v177_v9 = vsel %vm176_vm6, %v175_v62, %v170_v6 }
  0xc8   :  { %v245_v54 = vpop.xlane.xlu0 %244  ;;  %v356_v36 = vrot.slane %v269_v50, %v538_v35  ;;  %v230_v50 = vld [vmem:[#allocation3] sm:$0x3] }
  0xc9   :  { %v317_v28 = vrot.slane %v245_v54, %v538_v35 }
  0xca   :  { %v357_v35 = vsel %vm162_vm4, %v356_v36, %v352_v37 }
  0xcb   :  { %v113_v1 = vpop.xlane.xlu1 %112  ;;  %v318_v42 = vsel %vm162_vm4, %v317_v28, %v313_v40 }
  0xcc   :  { %v222_v4 = vrot.slane %v113_v1, %v556_v55  ;;  %v89_v5 = vpop.xlane.xlu0 %88 }
  0xcd   :  { %v182_v8 = vrot.slane %v89_v5, %v556_v55 }
  0xce   :  { %v223_v14 = vsel %vm183_vm7, %v222_v4, %v218_v7 }
  0xcf   :  { %v184_v16 = vsel %vm183_vm7, %v182_v8, %v177_v9  ;;  %v272_v19 = vpop.xlane.xlu1 %271 }
  0xd0   :  { %v225_v22 = vsel %vm224_vm8, %v223_v14, %v184_v16  ;;  %v248_v23 = vpop.xlane.xlu0 %247  ;;  %v361_v17 = vrot.slane %v272_v19, %v541_v38 }
  0xd1   :  { %v227_v29 = vadd.f32 %v225_v22, %v65_v15  ;;  %v322_v27 = vrot.slane %v248_v23, %v541_v38 }
  0xd2   :  { %v362_v44 = vsel %vm169_vm5, %v361_v17, %v357_v35 }
  0xd3   :  { %229 = vst.msk [vmem:[#allocation2] sm:$0x3] %vm30_vm0, %v227_v29  ;;  %v275_v10 = vpop.xlane.xlu1 %274  ;;  %v323_v46 = vsel %vm169_vm5, %v322_v27, %v318_v42 }
  0xd4   :  { %v251_v33 = vpop.xlane.xlu0 %250  ;;  %v366_v30 = vrot.slane %v275_v10, %v545_v43 }
  0xd5   :  { %v327_v39 = vrot.slane %v251_v33, %v545_v43 }
  0xd6   :  { %v367_v47 = vsel %vm176_vm6, %v366_v30, %v362_v44 }
  0xd7   :  { %v278_v41 = vpop.xlane.xlu1 %277  ;;  %v328_v48 = vsel %vm176_vm6, %v327_v39, %v323_v46 }
  0xd8   :  { %v371_v45 = vrot.slane %v278_v41, %v556_v55  ;;  %v254_v38 = vpop.xlane.xlu0 %253 }
  0xd9   :  { %v332_v43 = vrot.slane %v254_v38, %v556_v55 }
  0xda   :  { %v372_v49 = vsel %vm183_vm7, %v371_v45, %v367_v47  ;;  %v380_v51 = vld [vmem:[#allocation2] sm:$0x3] }
  0xdb   :  { %v333_v52 = vsel %vm183_vm7, %v332_v43, %v328_v48  ;;  %v381_v53 = vmul.f32 0.00390625, %v380_v51 }
  0xdc   :  { %v373_v54 = vsel %vm224_vm8, %v372_v49, %v333_v52 }
  0xdd   :  { %v375_v56 = vmax.f32 %v230_v50, %v373_v54  ;;  %382 = vst.msk [vmem:[#allocation7] sm:$0x3] %vm30_vm0, %v381_v53 }
  0xde   :  { %452 = shalt.err (!%p449_p9)
}
  0xdf   :  { %394 = dma.vmem_to_hbm [thread:$0]  %s392_s16, 32, %s627_s1, [#allocation6]   ;;  %376 = vst.msk [vmem:[#allocation3] sm:$0x3] %vm30_vm0, %v375_v56 }
  0xe0   :  { %s493_s20 = smov [#allocation8]  }
  0xe1   :  { %s401_s21 = sshll.u32 %s493_s20, 4  ;;  %s402_s21 = int_to_ptr.vmem [resolvable:$true] %s401_s21 }
  0xe2   :  { %s461_s22 = scalar_lea.vmem %s402_s21, 32  ;;  %p466_p11 = scmp.lt.s32.totalorder %s402_s21, %s402_s21 }
  0xe3   :  { %p462_p10 = scmp.ne.s32.totalorder %s402_s21, %s461_s22  ;;  %p467_p12 = scmp.lt.s32.totalorder %s461_s22, %s461_s22 }
  0xe5   :  { %p468_p13 = por %p467_p12, %p466_p11 }
  0xe6   :  { %v383_v55 = vld [vmem:[#allocation3] sm:$0x3] }
  0xe7   :  { %384 = vst.msk [vmem:[#allocation8] sm:$0x3] %vm30_vm0, %v383_v55  ;;  %p469_p0 = pnand %p468_p13, %p462_p10 }
  0xe9   :  { %472 = shalt.err (!%p469_p0)
}
  0xea   :  { %404 = dma.vmem_to_hbm [thread:$0]  %s402_s21, 32, %s628_s2, [#allocation9]  }
  0xeb   :  { %483 = dma.done.wait [#allocation6], 32  }
  0xec   :  { %484 = vsyncadd [#allocation6], 4294967264 }
  0xed   :  { %485 = dma.done.wait [#allocation9], 32  }
  0xee   :  { %486 = vsyncadd [#allocation9], 4294967264 }
  0xef   :  { %411 = vsyncpa [#allocation5], 1 }
  0xf0   :  { %412 = vsyncpa [#allocation6], 1 }
  0xf1   :  { %413 = vsyncpa [#allocation9], 1 }

</bundles_post_ra>
